<compile_context>
chip_gen: v7x
topology: tpu7x:2x2x1
jax: 0.10.0
libtpu: 0.0.40
codegen_flags: <defaults>
</compile_context>

<pallas_src>
import functools

import jax
import jax.numpy as jnp
import numpy as np
from jax.experimental import pallas as pl
from jax.experimental.pallas import tpu as pltpu


# ----------------------------------------------------------------------------
# Fused multi-step decoder kernel (one grid iteration = one decode step)
# ----------------------------------------------------------------------------
def _decoder_kernel(*refs, hidden_size: int, emb_size: int, is_init: bool):
    H, E = hidden_size, emb_size
    f32 = jnp.float32

    if is_init:
        (ids_ref, hc_in_ref, mem_ref, w1_ref, w2_ref, wl_ref, wv_ref, wi_ref,
         emb_ref, prob_ref, hc_out_ref, pm_ref, hc_ref) = refs
    else:
        (ids_ref, hc_in_ref, mem_ref, w1_ref, w2_ref, wl_ref, wv_ref,
         emb_ref, prob_ref, hc_out_ref, pm_ref, hc_ref) = refs
        wi_ref = None
    del ids_ref  # only used inside the embedding-row index_map

    wdt = mem_ref.dtype
    t = pl.program_id(0)

    # ---- one-time work on the first decode step ---------------------------
    @pl.when(t == 0)
    def _():
        # Step-invariant attention half: pm = encoder_memory @ W1_mem + b1
        pm_ref[...] = (
            jnp.dot(mem_ref[...], w1_ref[H:3 * H, :], preferred_element_type=f32)
            + w1_ref[3 * H:3 * H + 1, :].astype(f32))
        if is_init:
            # fused init transform: tanh([h;c] @ [wi1_t | wi2_t] + [bi1 | bi2])
            hc_i = jnp.tanh(
                jnp.dot(hc_in_ref[...].astype(wdt), wi_ref[0:H, :],
                        preferred_element_type=f32)
                + wi_ref[H:H + 1, :].astype(f32))                       # (2, 2H)
            hc_ref[...] = jnp.concatenate(
                [hc_i[0:1, 0:H], hc_i[1:2, H:2 * H]], axis=0)
        else:
            hc_ref[...] = hc_in_ref[...]

    h0 = hc_ref[0:1, :]                                                 # (1, H) f32
    c0 = hc_ref[1:2, :]                                                 # (1, H) f32

    # ---- attention over encoder memory -------------------------------------
    part_h = jnp.dot(h0.astype(wdt), w1_ref[0:H, :],
                     preferred_element_type=f32)                        # (1, H)
    temp = jnp.tanh(pm_ref[...] + part_h)                               # (S, H)
    # b2 omitted: softmax along dim 0 is invariant to an additive constant.
    scores = jnp.dot(temp.astype(wdt), w2_ref[...],
                     preferred_element_type=f32)                        # (S, 1)
    scores = scores - jnp.max(scores, axis=0, keepdims=True)
    e = jnp.exp(scores)
    attn = e / jnp.sum(e, axis=0, keepdims=True)                        # (S, 1)
    context = jnp.sum(attn * mem_ref[...].astype(f32),
                      axis=0, keepdims=True)                            # (1, 2H)

    # ---- embedded token: row already DMA'd by the BlockSpec pipeline -------
    # TODO(synk): nn.Dropout(p=0.15) treated as identity (inference/eval mode).
    x_emb = emb_ref[0]                                                  # (1, E)

    # ---- single LSTM step: three M=1 dots + folded bias (no VMEM bounce) ---
    gates = (
        jnp.dot(context.astype(wdt), wl_ref[0:2 * H, :],
                preferred_element_type=f32)
        + jnp.dot(x_emb, wl_ref[2 * H:2 * H + E, :],
                  preferred_element_type=f32)
        + jnp.dot(h0.astype(wdt), wl_ref[2 * H + E:3 * H + E, :],
                  preferred_element_type=f32)
        + wl_ref[3 * H + E:3 * H + E + 1, :].astype(f32))               # (1, 4H)

    i_g = jax.nn.sigmoid(gates[:, 0:H])
    f_g = jax.nn.sigmoid(gates[:, H:2 * H])
    g_g = jnp.tanh(gates[:, 2 * H:3 * H])
    o_g = jax.nn.sigmoid(gates[:, 3 * H:4 * H])

    c_t = f_g * c0 + i_g * g_g
    h_t = o_g * jnp.tanh(c_t)

    # ---- vocab projection + log_softmax (lane-padded V) --------------------
    logits = (jnp.dot(h_t.astype(wdt), wv_ref[0:H, :],
                      preferred_element_type=f32)
              + wv_ref[H:H + 1, :].astype(f32))                         # (1, Vp)
    logits = logits - jnp.max(logits, axis=1, keepdims=True)
    lse = jnp.log(jnp.sum(jnp.exp(logits), axis=1, keepdims=True))
    prob_ref[0] = logits - lse

    # ---- coalesced state update (carried in VMEM across grid steps) --------
    new_hc = jnp.concatenate([h_t, c_t], axis=0)                        # (2, H)
    hc_ref[...] = new_hc
    hc_out_ref[...] = new_hc


# ----------------------------------------------------------------------------
# One-time host-side packing (pre-transpose, fold biases, pad V, cast dtype)
# ----------------------------------------------------------------------------
def prepare_params(params, dtype=jnp.bfloat16):
    H = params["w_hh"].shape[1]
    V, E = params["emb"].shape
    Vp = ((V + 127) // 128) * 128

    w1 = params["w1"]                                    # (H, 3H) : [hidden|memory]
    w1_aug = jnp.concatenate(
        [w1[:, :H].T, w1[:, H:].T, params["b1"].reshape(1, H)], axis=0)  # (3H+1, H)

    w2_t = params["w2"].T                                                # (H, 1)

    w_lstm_aug = jnp.concatenate(
        [params["w_ih"].T, params["w_hh"].T,
         (params["b_ih"] + params["b_hh"]).reshape(1, 4 * H)], axis=0)   # (3H+E+1,4H)

    pad = Vp - V
    wv_t = jnp.pad(params["wv"].T, ((0, 0), (0, pad)))                   # (H, Vp)
    bv = jnp.pad(params["bv"].reshape(1, V), ((0, 0), (0, pad)),
                 constant_values=-1e30)                                  # (1, Vp)
    wv_aug = jnp.concatenate([wv_t, bv], axis=0)                         # (H+1, Vp)

    wi_aug = jnp.concatenate(
        [jnp.concatenate([params["wi1"].T, params["wi2"].T], axis=1),
         jnp.concatenate([params["bi1"].reshape(1, H),
                          params["bi2"].reshape(1, H)], axis=1)], axis=0)  # (H+1,2H)

    cast = lambda x: x.astype(dtype)
    return {
        "H": H, "E": E, "V": V, "Vp": Vp, "dtype": dtype,
        "emb3": cast(params["emb"]).reshape(V, 1, E),   # (V,1,E): legal (1,1,E) blocks
        "w1_aug": cast(w1_aug),
        "w2_t": cast(w2_t),
        "w_lstm_aug": cast(w_lstm_aug),
        "wv_aug": cast(wv_aug),
        "wi_aug": cast(wi_aug),
    }


# ----------------------------------------------------------------------------
# Fused multi-step (teacher-forced) decode: ONE pallas_call for all T steps
# ----------------------------------------------------------------------------
def decoder_forward_seq(packed, token_ids, hidden_vector, cell_vector,
                        encoder_memory, is_init=False):
    H, E, V, Vp = packed["H"], packed["E"], packed["V"], packed["Vp"]
    wdt = packed["dtype"]

    ids = jnp.asarray(token_ids, jnp.int32).reshape(-1)
    T = ids.shape[0]
    S = encoder_memory.shape[0]

    hc0 = jnp.concatenate([jnp.reshape(hidden_vector, (1, H)),
                           jnp.reshape(cell_vector, (1, H))],
                          axis=0).astype(jnp.float32)
    mem = encoder_memory.astype(wdt)

    const2 = lambda t, ids_ref: (0, 0)

    inputs = [ids, hc0, mem, packed["w1_aug"], packed["w2_t"],
              packed["w_lstm_aug"], packed["wv_aug"]]
    in_specs = [
        pl.BlockSpec((2, H), const2),                  # hc0
        pl.BlockSpec((S, 2 * H), const2),              # encoder memory (resident)
        pl.BlockSpec((3 * H + 1, H), const2),          # w1_aug (resident)
        pl.BlockSpec((H, 1), const2),                  # w2_t (resident)
        pl.BlockSpec((3 * H + E + 1, 4 * H), const2),  # fused LSTM weight (resident)
        pl.BlockSpec((H + 1, Vp), const2),             # vocab weight (resident)
    ]
    if is_init:
        inputs.append(packed["wi_aug"])
        in_specs.append(pl.BlockSpec((H + 1, 2 * H), const2))
    inputs.append(packed["emb3"])                      # per-step gathered row
    in_specs.append(pl.BlockSpec((1, 1, E), lambda t, ids_ref: (ids_ref[t], 0, 0)))

    out_shape = (
        jax.ShapeDtypeStruct((T, 1, Vp), jnp.float32),  # per-step log-probs
        jax.ShapeDtypeStruct((2, H), jnp.float32),      # final [h; c]
    )
    out_specs = (
        pl.BlockSpec((1, 1, Vp), lambda t, ids_ref: (t, 0, 0)),
        pl.BlockSpec((2, H), const2),
    )

    # Advisory cost estimate so XLA does not treat the fused decode as free.
    flops = int(2 * S * 2 * H * H
                + T * 2 * (H * H + S * H + (3 * H + E) * 4 * H + H * Vp))
    transcendentals = int(T * (S * H + S + 4 * H + Vp + 2 * H))
    bytes_accessed = int(
        sum(int(np.prod(x.shape)) * x.dtype.itemsize for x in inputs[1:-1])
        + T * (E * jnp.dtype(wdt).itemsize + Vp * 4) + 2 * H * 4)

    probs, hc_out = pl.pallas_call(
        functools.partial(_decoder_kernel, hidden_size=H, emb_size=E,
                          is_init=is_init),
        out_shape=out_shape,
        grid_spec=pltpu.PrefetchScalarGridSpec(
            num_scalar_prefetch=1,                 # token-id sequence -> SMEM
            grid=(T,),
            in_specs=in_specs,
            out_specs=out_specs,
            scratch_shapes=[
                pltpu.VMEM((S, H), jnp.float32),   # pm = mem @ W1_mem + b1
                pltpu.VMEM((2, H), jnp.float32),   # carried [h; c] state
            ]),
        compiler_params=pltpu.CompilerParams(
            dimension_semantics=("arbitrary",)),
        cost_estimate=pl.CostEstimate(flops=flops,
                                      transcendentals=transcendentals,
                                      bytes_accessed=bytes_accessed),
    )(*inputs)

    probs = probs.reshape(T, Vp)[:, :V]
    h_t = hc_out[0:1].reshape(1, 1, H)
    c_t = hc_out[1:2].reshape(1, 1, H)
    return probs, h_t, c_t


# ----------------------------------------------------------------------------
# Single-step wrapper (matches the PyTorch module's forward signature)
# ----------------------------------------------------------------------------
def decoder_forward(packed, input_word_index, hidden_vector, cell_vector,
                    encoder_memory, is_init=False):
    ids = jnp.asarray(input_word_index, jnp.int32).reshape((1,))
    probs, h_t, c_t = decoder_forward_seq(packed, ids, hidden_vector, cell_vector,
                                          encoder_memory, is_init=is_init)
    return probs[0:1], h_t, c_t


# ----------------------------------------------------------------------------
# Pure-JAX references (direct transcription of the PyTorch forward)
# ----------------------------------------------------------------------------
def decoder_forward_ref(params, input_word_index, hidden_vector, cell_vector,
                        encoder_memory, is_init=False):
    H = params["w_hh"].shape[1]
    h = hidden_vector.reshape(1, H)
    c = cell_vector.reshape(1, H)
    if is_init:
        h = jnp.tanh(h @ params["wi1"].T + params["bi1"])
        c = jnp.tanh(c @ params["wi2"].T + params["bi2"])
    S = encoder_memory.shape[0]
    nh = jnp.broadcast_to(h, (S, H))
    com = jnp.concatenate([nh, encoder_memory], axis=1)
    temp = jnp.tanh(com @ params["w1"].T + params["b1"])
    w = temp @ params["w2"].T + params["b2"]
    w = jax.nn.softmax(w, axis=0)
    ctx = w.T @ encoder_memory
    emb = params["emb"][jnp.asarray(input_word_index, jnp.int32)].reshape(1, -1)
    x = jnp.concatenate([ctx, emb], axis=1)
    gates = (x @ params["w_ih"].T + params["b_ih"]
             + h @ params["w_hh"].T + params["b_hh"])
    i = jax.nn.sigmoid(gates[:, 0:H])
    f = jax.nn.sigmoid(gates[:, H:2 * H])
    g = jnp.tanh(gates[:, 2 * H:3 * H])
    o = jax.nn.sigmoid(gates[:, 3 * H:4 * H])
    c_t = f * c + i * g
    h_t = o * jnp.tanh(c_t)
    logits = h_t @ params["wv"].T + params["bv"]
    prob = jax.nn.log_softmax(logits, axis=1)
    return prob, h_t.reshape(1, 1, H), c_t.reshape(1, 1, H)


def decoder_forward_seq_ref(params, token_ids, hidden_vector, cell_vector,
                            encoder_memory, is_init=False):
    probs = []
    h, c = hidden_vector, cell_vector
    for i, tok in enumerate(np.asarray(token_ids)):
        p, h, c = decoder_forward_ref(params, jnp.int32(int(tok)), h, c,
                                      encoder_memory,
                                      is_init=(is_init and i == 0))
        probs.append(p)
    return jnp.concatenate(probs, axis=0), h, c


# ----------------------------------------------------------------------------
# Deterministic parameter construction (shapes from the module's __init__)
# ----------------------------------------------------------------------------
def make_params(key, num_vocab, input_size, hidden_size):
    H, E, V = hidden_size, input_size, num_vocab
    ks = jax.random.split(key, 16)
    u = lambda k, shape, s=0.1: jax.random.uniform(k, shape, jnp.float32, -s, s)
    return {
        "emb":  u(ks[0], (V, E)),
        "w1":   u(ks[1], (H, 3 * H)),   "b1":  u(ks[2], (H,)),
        "w2":   u(ks[3], (1, H)),       "b2":  u(ks[4], (1,)),
        "w_ih": u(ks[5], (4 * H, E + 2 * H)),
        "w_hh": u(ks[6], (4 * H, H)),
        "b_ih": u(ks[7], (4 * H,)),     "b_hh": u(ks[8], (4 * H,)),
        "wi1":  u(ks[9], (H, H)),       "bi1": u(ks[10], (H,)),
        "wi2":  u(ks[11], (H, H)),      "bi2": u(ks[12], (H,)),
        "wv":   u(ks[13], (V, H)),      "bv":  u(ks[14], (V,)),
    }


if __name__ == "__main__":
    num_vocab, input_size, hidden_size, seq_len, n_steps = 64, 32, 32, 8, 6

    key = jax.random.PRNGKey(0)
    kp, kh, kc, km, kt = jax.random.split(key, 5)

    params = make_params(kp, num_vocab, input_size, hidden_size)

    input_word_index = jnp.array(5, dtype=jnp.int32)
    token_ids = jax.random.randint(kt, (n_steps,), 0, num_vocab, jnp.int32)
    hidden_vector = jax.random.normal(kh, (1, 1, hidden_size), jnp.float32)
    cell_vector = jax.random.normal(kc, (1, 1, hidden_size), jnp.float32)
    encoder_memory = jax.random.normal(km, (seq_len, 2 * hidden_size), jnp.float32)

    ok = True

    # --- single-step forward (module signature), f32-packed weights ---------
    packed_f32 = prepare_params(params, dtype=jnp.float32)
    for is_init in (False, True):
        prob, h_t, c_t = decoder_forward(packed_f32, input_word_index,
                                         hidden_vector, cell_vector,
                                         encoder_memory, is_init=is_init)
        jax.block_until_ready((prob, h_t, c_t))
        prob_r, h_r, c_r = decoder_forward_ref(params, input_word_index,
                                               hidden_vector, cell_vector,
                                               encoder_memory, is_init=is_init)
        ok &= np.allclose(np.asarray(prob), np.asarray(prob_r), atol=5e-4)
        ok &= np.allclose(np.asarray(h_t), np.asarray(h_r), atol=5e-4)
        ok &= np.allclose(np.asarray(c_t), np.asarray(c_r), atol=5e-4)

    # --- fused multi-step decode (one pallas_call for all steps), f32 -------
    probs, h_t, c_t = decoder_forward_seq(packed_f32, token_ids, hidden_vector,
                                          cell_vector, encoder_memory,
                                          is_init=True)
    jax.block_until_ready((probs, h_t, c_t))
    probs_r, h_r, c_r = decoder_forward_seq_ref(params, token_ids, hidden_vector,
                                                cell_vector, encoder_memory,
                                                is_init=True)
    ok &= np.allclose(np.asarray(probs), np.asarray(probs_r), atol=1e-3)
    ok &= np.allclose(np.asarray(h_t), np.asarray(h_r), atol=1e-3)
    ok &= np.allclose(np.asarray(c_t), np.asarray(c_r), atol=1e-3)

    # --- fused multi-step decode with bf16-resident weights (f32 accum) -----
    packed_bf16 = prepare_params(params, dtype=jnp.bfloat16)
    params_q = {k: v.astype(jnp.bfloat16).astype(jnp.float32)
                for k, v in params.items()}
    mem_q = encoder_memory.astype(jnp.bfloat16).astype(jnp.float32)
    probs, h_t, c_t = decoder_forward_seq(packed_bf16, token_ids, hidden_vector,
                                          cell_vector, encoder_memory,
                                          is_init=True)
    jax.block_until_ready((probs, h_t, c_t))
    probs_r, h_r, c_r = decoder_forward_seq_ref(params_q, token_ids, hidden_vector,
                                                cell_vector, mem_q, is_init=True)
    ok &= np.allclose(np.asarray(probs), np.asarray(probs_r), atol=5e-2)
    ok &= np.allclose(np.asarray(h_t), np.asarray(h_r), atol=5e-2)
    ok &= np.allclose(np.asarray(c_t), np.asarray(c_r), atol=5e-2)

    assert ok, "Pallas kernel output does not match pure-JAX reference"
    print("KERNEL_OK")
</pallas_src>

<mosaic_0001>
module attributes {stable_mosaic.version = 11 : i64} {
  func.func @_decoder_kernel(%arg0: i32, %arg1: memref<1xi32, #tpu.memory_space<smem>>, %arg2: memref<2x32xf32, #tpu.memory_space<vmem>>, %arg3: memref<8x64xf32, #tpu.memory_space<vmem>>, %arg4: memref<97x32xf32, #tpu.memory_space<vmem>>, %arg5: memref<32x1xf32, #tpu.memory_space<vmem>>, %arg6: memref<129x128xf32, #tpu.memory_space<vmem>>, %arg7: memref<33x128xf32, #tpu.memory_space<vmem>>, %arg8: memref<1x1x32xf32, #tpu.memory_space<vmem>>, %arg9: memref<1x1x128xf32, #tpu.memory_space<vmem>>, %arg10: memref<2x32xf32, #tpu.memory_space<vmem>>, %arg11: memref<8x32xf32, #tpu.memory_space<vmem>>, %arg12: memref<2x32xf32, #tpu.memory_space<vmem>>) attributes {dimension_semantics = [#tpu.dimension_semantics<arbitrary>], iteration_bounds = array<i64: 1>, scalar_prefetch = 1 : i64, scratch_operands = 2 : i64, tpu.core_type = #tpu.core_type<tc>, window_params = [{pipeline_mode = #tpu.pipeline_mode<synchronous>, transform_indices = @transform_0, window_bounds = array<i64: 2, 32>}, {pipeline_mode = #tpu.pipeline_mode<synchronous>, transform_indices = @transform_1, window_bounds = array<i64: 8, 64>}, {pipeline_mode = #tpu.pipeline_mode<synchronous>, transform_indices = @transform_2, window_bounds = array<i64: 97, 32>}, {pipeline_mode = #tpu.pipeline_mode<synchronous>, transform_indices = @transform_3, window_bounds = array<i64: 32, 1>}, {pipeline_mode = #tpu.pipeline_mode<synchronous>, transform_indices = @transform_4, window_bounds = array<i64: 129, 128>}, {pipeline_mode = #tpu.pipeline_mode<synchronous>, transform_indices = @transform_5, window_bounds = array<i64: 33, 128>}, {transform_indices = @transform_6, window_bounds = array<i64: 1, 1, 32>}, {transform_indices = @transform_7, window_bounds = array<i64: 1, 1, 128>}, {pipeline_mode = #tpu.pipeline_mode<synchronous>, transform_indices = @transform_8, window_bounds = array<i64: 2, 32>}]} {
    %c0_i32 = arith.constant 0 : i32
    %0 = arith.cmpi eq, %arg0, %c0_i32 : i32
    %1 = arith.extui %0 : i1 to i32
    %c0_i32_0 = arith.constant 0 : i32
    %2 = arith.cmpi ne, %1, %c0_i32_0 : i32
    scf.if %2 {
      %c0_42 = arith.constant 0 : index
      %c0_43 = arith.constant 0 : index
      %84 = vector.load %arg3[%c0_42, %c0_43] : memref<8x64xf32, #tpu.memory_space<vmem>>, vector<8x64xf32>
      %c32_44 = arith.constant 32 : index
      %c0_45 = arith.constant 0 : index
      %85 = vector.load %arg4[%c32_44, %c0_45] : memref<97x32xf32, #tpu.memory_space<vmem>>, vector<64x32xf32>
      %cst_46 = arith.constant dense<0.000000e+00> : vector<8x32xf32>
      %86 = tpu.matmul %84, %85, %cst_46 {dimension_numbers = #tpu.dot_dimension_numbers<[1], [0], [0], [1], [0, 0, 1, 1], [], []>} : vector<8x64xf32>, vector<64x32xf32>, vector<8x32xf32> -> vector<8x32xf32>
      %c96_47 = arith.constant 96 : index
      %c0_48 = arith.constant 0 : index
      %87 = vector.load %arg4[%c96_47, %c0_48] : memref<97x32xf32, #tpu.memory_space<vmem>>, vector<1x32xf32>
      %88 = vector.broadcast %87 : vector<1x32xf32> to vector<8x32xf32>
      %89 = arith.addf %86, %88 : vector<8x32xf32>
      %c0_49 = arith.constant 0 : index
      %c0_50 = arith.constant 0 : index
      %90 = vector.load %arg11[%c0_49, %c0_50] : memref<8x32xf32, #tpu.memory_space<vmem>>, vector<8x32xf32>
      tpu.vector_store %arg11[%c0_49, %c0_50], %89 {strides = array<i32>} : memref<8x32xf32, #tpu.memory_space<vmem>>, vector<8x32xf32>,
      %c0_51 = arith.constant 0 : index
      %c0_52 = arith.constant 0 : index
      %91 = vector.load %arg2[%c0_51, %c0_52] : memref<2x32xf32, #tpu.memory_space<vmem>>, vector<2x32xf32>
      %c0_53 = arith.constant 0 : index
      %c0_54 = arith.constant 0 : index
      %92 = vector.load %arg12[%c0_53, %c0_54] : memref<2x32xf32, #tpu.memory_space<vmem>>, vector<2x32xf32>
      tpu.vector_store %arg12[%c0_53, %c0_54], %91 {strides = array<i32>} : memref<2x32xf32, #tpu.memory_space<vmem>>, vector<2x32xf32>,
    } else {
    }
    %c0 = arith.constant 0 : index
    %c0_1 = arith.constant 0 : index
    %3 = vector.load %arg12[%c0, %c0_1] : memref<2x32xf32, #tpu.memory_space<vmem>>, vector<1x32xf32>
    %c1 = arith.constant 1 : index
    %c0_2 = arith.constant 0 : index
    %4 = vector.load %arg12[%c1, %c0_2] : memref<2x32xf32, #tpu.memory_space<vmem>>, vector<1x32xf32>
    %c0_3 = arith.constant 0 : index
    %c0_4 = arith.constant 0 : index
    %5 = vector.load %arg4[%c0_3, %c0_4] : memref<97x32xf32, #tpu.memory_space<vmem>>, vector<32x32xf32>
    %cst = arith.constant dense<0.000000e+00> : vector<1x32xf32>
    %6 = tpu.matmul %3, %5, %cst {dimension_numbers = #tpu.dot_dimension_numbers<[1], [0], [0], [1], [0, 0, 1, 1], [], []>} : vector<1x32xf32>, vector<32x32xf32>, vector<1x32xf32> -> vector<1x32xf32>
    %c0_5 = arith.constant 0 : index
    %c0_6 = arith.constant 0 : index
    %7 = vector.load %arg11[%c0_5, %c0_6] : memref<8x32xf32, #tpu.memory_space<vmem>>, vector<8x32xf32>
    %8 = vector.broadcast %6 : vector<1x32xf32> to vector<8x32xf32>
    %9 = arith.addf %7, %8 : vector<8x32xf32>
    %10 = math.tanh %9 : vector<8x32xf32>
    %c0_7 = arith.constant 0 : index
    %c0_8 = arith.constant 0 : index
    %11 = vector.load %arg5[%c0_7, %c0_8] : memref<32x1xf32, #tpu.memory_space<vmem>>, vector<32x1xf32>
    %cst_9 = arith.constant dense<0.000000e+00> : vector<8x1xf32>
    %12 = tpu.matmul %10, %11, %cst_9 {dimension_numbers = #tpu.dot_dimension_numbers<[1], [0], [0], [1], [0, 0, 1, 1], [], []>} : vector<8x32xf32>, vector<32x1xf32>, vector<8x1xf32> -> vector<8x1xf32>
    %cst_10 = arith.constant dense<0xFF800000> : vector<1xf32>
    %13 = vector.multi_reduction <maximumf>, %12, %cst_10 [0] : vector<8x1xf32> to vector<1xf32>
    %14 = vector.shape_cast %13 : vector<1xf32> to vector<1x1xf32>
    %15 = vector.broadcast %14 : vector<1x1xf32> to vector<8x1xf32>
    %16 = arith.subf %12, %15 : vector<8x1xf32>
    %17 = math.exp %16 : vector<8x1xf32>
    %cst_11 = arith.constant dense<0.000000e+00> : vector<1xf32>
    %18 = vector.multi_reduction <add>, %17, %cst_11 [0] : vector<8x1xf32> to vector<1xf32>
    %19 = vector.shape_cast %18 : vector<1xf32> to vector<1x1xf32>
    %20 = vector.broadcast %19 : vector<1x1xf32> to vector<8x1xf32>
    %21 = arith.divf %17, %20 : vector<8x1xf32>
    %c0_12 = arith.constant 0 : index
    %c0_13 = arith.constant 0 : index
    %22 = vector.load %arg3[%c0_12, %c0_13] : memref<8x64xf32, #tpu.memory_space<vmem>>, vector<8x64xf32>
    %23 = vector.broadcast %21 : vector<8x1xf32> to vector<8x64xf32>
    %24 = arith.mulf %23, %22 : vector<8x64xf32>
    %cst_14 = arith.constant dense<0.000000e+00> : vector<64xf32>
    %25 = vector.multi_reduction <add>, %24, %cst_14 [0] : vector<8x64xf32> to vector<64xf32>
    %26 = vector.shape_cast %25 : vector<64xf32> to vector<1x64xf32>
    %c0_15 = arith.constant 0 : index
    %c0_16 = arith.constant 0 : index
    %c0_17 = arith.constant 0 : index
    %27 = vector.load %arg8[%c0_15, %c0_16, %c0_17] : memref<1x1x32xf32, #tpu.memory_space<vmem>>, vector<1x1x32xf32>
    %28 = vector.shape_cast %27 : vector<1x1x32xf32> to vector<1x32xf32>
    %c0_18 = arith.constant 0 : index
    %c0_19 = arith.constant 0 : index
    %29 = vector.load %arg6[%c0_18, %c0_19] : memref<129x128xf32, #tpu.memory_space<vmem>>, vector<64x128xf32>
    %cst_20 = arith.constant dense<0.000000e+00> : vector<1x128xf32>
    %30 = tpu.matmul %26, %29, %cst_20 {dimension_numbers = #tpu.dot_dimension_numbers<[1], [0], [0], [1], [0, 0, 1, 1], [], []>} : vector<1x64xf32>, vector<64x128xf32>, vector<1x128xf32> -> vector<1x128xf32>
    %c64 = arith.constant 64 : index
    %c0_21 = arith.constant 0 : index
    %31 = vector.load %arg6[%c64, %c0_21] : memref<129x128xf32, #tpu.memory_space<vmem>>, vector<32x128xf32>
    %cst_22 = arith.constant dense<0.000000e+00> : vector<1x128xf32>
    %32 = tpu.matmul %28, %31, %cst_22 {dimension_numbers = #tpu.dot_dimension_numbers<[1], [0], [0], [1], [0, 0, 1, 1], [], []>} : vector<1x32xf32>, vector<32x128xf32>, vector<1x128xf32> -> vector<1x128xf32>
    %33 = arith.addf %30, %32 : vector<1x128xf32>
    %c96 = arith.constant 96 : index
    %c0_23 = arith.constant 0 : index
    %34 = vector.load %arg6[%c96, %c0_23] : memref<129x128xf32, #tpu.memory_space<vmem>>, vector<32x128xf32>
    %cst_24 = arith.constant dense<0.000000e+00> : vector<1x128xf32>
    %35 = tpu.matmul %3, %34, %cst_24 {dimension_numbers = #tpu.dot_dimension_numbers<[1], [0], [0], [1], [0, 0, 1, 1], [], []>} : vector<1x32xf32>, vector<32x128xf32>, vector<1x128xf32> -> vector<1x128xf32>
    %36 = arith.addf %33, %35 : vector<1x128xf32>
    %c128 = arith.constant 128 : index
    %c0_25 = arith.constant 0 : index
    %37 = vector.load %arg6[%c128, %c0_25] : memref<129x128xf32, #tpu.memory_space<vmem>>, vector<1x128xf32>
    %38 = arith.addf %36, %37 : vector<1x128xf32>
    %39 = vector.extract_strided_slice %38 {offsets = [0, 0], sizes = [1, 32], strides = [1, 1]} : vector<1x128xf32> to vector<1x32xf32>
    %40 = arith.negf %39 : vector<1x32xf32>
    %41 = math.exp %40 : vector<1x32xf32>
    %cst_26 = arith.constant 1.000000e+00 : f32
    %42 = vector.broadcast %cst_26 : f32 to vector<1x32xf32>
    %43 = arith.addf %42, %41 : vector<1x32xf32>
    %44 = arith.divf %42, %43 : vector<1x32xf32>
    %45 = vector.extract_strided_slice %38 {offsets = [0, 32], sizes = [1, 32], strides = [1, 1]} : vector<1x128xf32> to vector<1x32xf32>
    %46 = arith.negf %45 : vector<1x32xf32>
    %47 = math.exp %46 : vector<1x32xf32>
    %cst_27 = arith.constant 1.000000e+00 : f32
    %48 = vector.broadcast %cst_27 : f32 to vector<1x32xf32>
    %49 = arith.addf %48, %47 : vector<1x32xf32>
    %50 = arith.divf %48, %49 : vector<1x32xf32>
    %51 = vector.extract_strided_slice %38 {offsets = [0, 64], sizes = [1, 32], strides = [1, 1]} : vector<1x128xf32> to vector<1x32xf32>
    %52 = math.tanh %51 : vector<1x32xf32>
    %53 = vector.extract_strided_slice %38 {offsets = [0, 96], sizes = [1, 32], strides = [1, 1]} : vector<1x128xf32> to vector<1x32xf32>
    %54 = arith.negf %53 : vector<1x32xf32>
    %55 = math.exp %54 : vector<1x32xf32>
    %cst_28 = arith.constant 1.000000e+00 : f32
    %56 = vector.broadcast %cst_28 : f32 to vector<1x32xf32>
    %57 = arith.addf %56, %55 : vector<1x32xf32>
    %58 = arith.divf %56, %57 : vector<1x32xf32>
    %59 = arith.mulf %50, %4 : vector<1x32xf32>
    %60 = arith.mulf %44, %52 : vector<1x32xf32>
    %61 = arith.addf %59, %60 : vector<1x32xf32>
    %62 = math.tanh %61 : vector<1x32xf32>
    %63 = arith.mulf %58, %62 : vector<1x32xf32>
    %c0_29 = arith.constant 0 : index
    %c0_30 = arith.constant 0 : index
    %64 = vector.load %arg7[%c0_29, %c0_30] : memref<33x128xf32, #tpu.memory_space<vmem>>, vector<32x128xf32>
    %cst_31 = arith.constant dense<0.000000e+00> : vector<1x128xf32>
    %65 = tpu.matmul %63, %64, %cst_31 {dimension_numbers = #tpu.dot_dimension_numbers<[1], [0], [0], [1], [0, 0, 1, 1], [], []>} : vector<1x32xf32>, vector<32x128xf32>, vector<1x128xf32> -> vector<1x128xf32>
    %c32 = arith.constant 32 : index
    %c0_32 = arith.constant 0 : index
    %66 = vector.load %arg7[%c32, %c0_32] : memref<33x128xf32, #tpu.memory_space<vmem>>, vector<1x128xf32>
    %67 = arith.addf %65, %66 : vector<1x128xf32>
    %cst_33 = arith.constant dense<0xFF800000> : vector<1xf32>
    %68 = vector.multi_reduction <maximumf>, %67, %cst_33 [1] : vector<1x128xf32> to vector<1xf32>
    %69 = vector.shape_cast %68 : vector<1xf32> to vector<1x1xf32>
    %70 = vector.broadcast %69 : vector<1x1xf32> to vector<1x128xf32>
    %71 = arith.subf %67, %70 : vector<1x128xf32>
    %72 = math.exp %71 : vector<1x128xf32>
    %cst_34 = arith.constant dense<0.000000e+00> : vector<1xf32>
    %73 = vector.multi_reduction <add>, %72, %cst_34 [1] : vector<1x128xf32> to vector<1xf32>
    %74 = vector.shape_cast %73 : vector<1xf32> to vector<1x1xf32>
    %75 = math.log %74 : vector<1x1xf32>
    %76 = vector.broadcast %75 : vector<1x1xf32> to vector<1x128xf32>
    %77 = arith.subf %71, %76 : vector<1x128xf32>
    %c0_35 = arith.constant 0 : index
    %c0_36 = arith.constant 0 : index
    %c0_37 = arith.constant 0 : index
    %78 = vector.load %arg9[%c0_35, %c0_36, %c0_37] : memref<1x1x128xf32, #tpu.memory_space<vmem>>, vector<1x1x128xf32>
    %79 = vector.shape_cast %78 : vector<1x1x128xf32> to vector<1x128xf32>
    %80 = vector.shape_cast %77 : vector<1x128xf32> to vector<1x1x128xf32>
    tpu.vector_store %arg9[%c0_35, %c0_36, %c0_37], %80 {strides = array<i32>} : memref<1x1x128xf32, #tpu.memory_space<vmem>>, vector<1x1x128xf32>,
    %81 = tpu.concatenate %63, %61 in 0 : vector<1x32xf32>, vector<1x32xf32> -> vector<2x32xf32>
    %c0_38 = arith.constant 0 : index
    %c0_39 = arith.constant 0 : index
    %82 = vector.load %arg12[%c0_38, %c0_39] : memref<2x32xf32, #tpu.memory_space<vmem>>, vector<2x32xf32>
    tpu.vector_store %arg12[%c0_38, %c0_39], %81 {strides = array<i32>} : memref<2x32xf32, #tpu.memory_space<vmem>>, vector<2x32xf32>,
    %c0_40 = arith.constant 0 : index
    %c0_41 = arith.constant 0 : index
    %83 = vector.load %arg10[%c0_40, %c0_41] : memref<2x32xf32, #tpu.memory_space<vmem>>, vector<2x32xf32>
    tpu.vector_store %arg10[%c0_40, %c0_41], %81 {strides = array<i32>} : memref<2x32xf32, #tpu.memory_space<vmem>>, vector<2x32xf32>,
    return
  }
  func.func @transform_0(%arg0: i32, %arg1: memref<1xi32, #tpu.memory_space<smem>>) -> (i32, i32) {
    %c0_i32 = arith.constant 0 : i32
    %c0_i32_0 = arith.constant 0 : i32
    %c0_i32_1 = arith.constant 0 : i32
    return %c0_i32, %c0_i32_0 : i32, i32
  }
  func.func @transform_1(%arg0: i32, %arg1: memref<1xi32, #tpu.memory_space<smem>>) -> (i32, i32) {
    %c0_i32 = arith.constant 0 : i32
    %c0_i32_0 = arith.constant 0 : i32
    %c0_i32_1 = arith.constant 0 : i32
    return %c0_i32, %c0_i32_0 : i32, i32
  }
  func.func @transform_2(%arg0: i32, %arg1: memref<1xi32, #tpu.memory_space<smem>>) -> (i32, i32) {
    %c0_i32 = arith.constant 0 : i32
    %c0_i32_0 = arith.constant 0 : i32
    %c0_i32_1 = arith.constant 0 : i32
    return %c0_i32, %c0_i32_0 : i32, i32
  }
  func.func @transform_3(%arg0: i32, %arg1: memref<1xi32, #tpu.memory_space<smem>>) -> (i32, i32) {
    %c0_i32 = arith.constant 0 : i32
    %c0_i32_0 = arith.constant 0 : i32
    %c0_i32_1 = arith.constant 0 : i32
    return %c0_i32, %c0_i32_0 : i32, i32
  }
  func.func @transform_4(%arg0: i32, %arg1: memref<1xi32, #tpu.memory_space<smem>>) -> (i32, i32) {
    %c0_i32 = arith.constant 0 : i32
    %c0_i32_0 = arith.constant 0 : i32
    %c0_i32_1 = arith.constant 0 : i32
    return %c0_i32, %c0_i32_0 : i32, i32
  }
  func.func @transform_5(%arg0: i32, %arg1: memref<1xi32, #tpu.memory_space<smem>>) -> (i32, i32) {
    %c0_i32 = arith.constant 0 : i32
    %c0_i32_0 = arith.constant 0 : i32
    %c0_i32_1 = arith.constant 0 : i32
    return %c0_i32, %c0_i32_0 : i32, i32
  }
  func.func @transform_6(%arg0: i32, %arg1: memref<1xi32, #tpu.memory_space<smem>>) -> (i32, i32, i32) {
    %0 = arith.index_cast %arg0 : i32 to index
    %1 = memref.load %arg1[%0] : memref<1xi32, #tpu.memory_space<smem>>
    %c0_i32 = arith.constant 0 : i32
    %c0_i32_0 = arith.constant 0 : i32
    %c0_i32_1 = arith.constant 0 : i32
    return %1, %c0_i32, %c0_i32_0 : i32, i32, i32
  }
  func.func @transform_7(%arg0: i32, %arg1: memref<1xi32, #tpu.memory_space<smem>>) -> (i32, i32, i32) {
    %c0_i32 = arith.constant 0 : i32
    %c0_i32_0 = arith.constant 0 : i32
    %c0_i32_1 = arith.constant 0 : i32
    return %arg0, %c0_i32, %c0_i32_0 : i32, i32, i32
  }
  func.func @transform_8(%arg0: i32, %arg1: memref<1xi32, #tpu.memory_space<smem>>) -> (i32, i32) {
    %c0_i32 = arith.constant 0 : i32
    %c0_i32_0 = arith.constant 0 : i32
    %c0_i32_1 = arith.constant 0 : i32
    return %c0_i32, %c0_i32_0 : i32, i32
  }
}

</mosaic_0001>

<bundles_post_ra>
// kernel: tpu_custom_call.1
= control target key start
LH: loop header
LB: loop body
LE: loop exit
PB: predicated region body
PF: predicated region fallthrough
CT: control target
= control target key end

     0   :  { %16 = vsyncpa [#allocation7], 0  ;;  %v1018_v3 = vmov 0.0|0.0   ;;  %vm1019_vm0 = vmmov 0   ;;  %v1020_v6 = vmov 0.0   ;;  %vm141_vm1 = vcmask 254976   ;;  %s1291_s0 = inlined_call_operand.<no memory space> [shape: s32[1], index: 0, kind: input, shape index: {}]   ;;  %s1292_s1 = inlined_call_operand.vmem [shape: f32[2,32], index: 1, kind: input, shape index: {}]   ;;  %s1293_s2 = inlined_call_operand.vmem [shape: f32[8,64], index: 2, kind: input, shape index: {}]   ;;  %s1294_s3 = inlined_call_operand.vmem [shape: f32[97,32], index: 3, kind: input, shape index: {}]   ;;  %s1295_s4 = inlined_call_operand.vmem [shape: f32[32,1], index: 4, kind: input, shape index: {}]   ;;  %s1296_s5 = inlined_call_operand.vmem [shape: f32[129,128], index: 5, kind: input, shape index: {}]   ;;  %s1297_s6 = inlined_call_operand.vmem [shape: f32[33,128], index: 6, kind: input, shape index: {}]   ;;  %s1298_s7 = inlined_call_operand.vmem [shape: f32[64,1,32], index: 7, kind: input, shape index: {}]   ;;  %s1299_s8 = inlined_call_operand.hbm [shape: f32[1,1,128], index: 8, kind: output, shape index: {0}]   ;;  %s1300_s9 = inlined_call_operand.hbm [shape: f32[2,32], index: 9, kind: output, shape index: {1}]  }
   0x1   :  { %v51_v0 = vld [vmem:[%s1294_s3 + $0x20] sm:$0xff]  ;;  %v52_v1 = vld [vmem:[%s1294_s3 + $0x28] sm:$0xff]  ;;  %v53_v2 = vld [vmem:[%s1294_s3 + $0x30] sm:$0xff]  ;;  %889 = vmatprep.subr.bf16.mxu0 %v1018_v3  ;;  %812 = vmatprep.mubr.msk.f32.mxu0 %vm1019_vm0, %v1020_v6 }
   0x2   :  { %v890_v4 = vpack.c.bf16 %v52_v1, %v51_v0  ;;  %v54_v5 = vld [vmem:[%s1294_s3 + $0x38] sm:$0xff]  ;;  %v55_v7 = vld [vmem:[%s1294_s3 + $0x40] sm:$0xff]  ;;  %901 = vmatprep.subr.bf16.mxu1 %v1018_v3  ;;  %823 = vmatprep.mubr.msk.f32.mxu1 %vm1019_vm0, %v1020_v6  ;;  %v146_v10 = vld [vmem:[%s1294_s3 + $0x8] sm:$0xff] }
   0x3   :  { %v893_v8 = vpack.c.bf16 %v54_v5, %v53_v2  ;;  %v145_v9 = vld [vmem:[%s1294_s3] sm:$0xff]  ;;  %v147_v11 = vld [vmem:[%s1294_s3 + $0x10] sm:$0xff]  ;;  %v56_v12 = vld [vmem:[%s1294_s3 + $0x48] sm:$0xff] }
   0x4   :  { %891 = vmatpush3.bf16.msra.mxu0 %v890_v4  ;;  %v902_v13 = vpack.c.bf16 %v146_v10, %v145_v9  ;;  %v148_v14 = vld [vmem:[%s1294_s3 + $0x18] sm:$0xff]  ;;  %v140_v15 = vld [vmem:[%s1292_s1] sm:$0x3] }
   0x5   :  { %892 = vmatprep.subr.bf16.mxu0 %v1018_v3  ;;  %142 = vst.msk [vmem:[#allocation3] sm:$0x3] %vm141_vm1, %v140_v15 }
   0x6   :  { %17 = vsyncpa [#allocation9], 0  ;;  %903 = vmatpush3.bf16.msra.mxu1 %v902_v13  ;;  %v905_v16 = vpack.c.bf16 %v148_v14, %v147_v11  ;;  %v896_v17 = vpack.c.bf16 %v56_v12, %v55_v7  ;;  %v57_v18 = vld [vmem:[%s1294_s3 + $0x50] sm:$0xff]  ;;  %v58_v19 = vld [vmem:[%s1294_s3 + $0x58] sm:$0xff]  ;;  %vm138_vm2 = vcmask 261120   ;;  %vm64_vm3 = vcmask 523264  }
   0x7   :  { %904 = vmatprep.subr.bf16.mxu1 %v1018_v3  ;;  %v899_v20 = vpack.c.bf16 %v58_v19, %v57_v18  ;;  %v1136_v22 = vld [vmem:[%s1293_s2] sm:$0xff]  ;;  %v231_v24 = vld [vmem:[%s1295_s4 + $0x8] sm:$0xff]  ;;  %v232_v25 = vld [vmem:[%s1295_s4 + $0x10] sm:$0xff]  ;;  %v224_v30 = vlaneseq  ;;  %v1021_v42 = vmov 0   ;;  %vm307_vm4 = vcmask 7168   ;;  %p42_p0 = scmp.lt.s32.totalorder %s1291_s0, 63 }
   0x8   :  { %894 = vmatpush3.bf16.msra.mxu0 %v893_v8  ;;  %v230_v23 = vld [vmem:[%s1295_s4] sm:$0xff]  ;;  %v233_v27 = vld [vmem:[%s1295_s4 + $0x18] sm:$0xff]  ;;  %951 = vset.pattern.permute.xlu0 %v1021_v42  ;;  %v344_v0 = vld [vmem:[%s1296_s5 + $0x8] sm:$0xff]  ;;  %s1022_s13 = smov 32   ;;  %s1023_s15 = smov 64   ;;  %vm686_vm5 = vcmask 1040384  }
   0x9   :  { %895 = vmatprep.subr.bf16.mxu0 %v1018_v3  ;;  %v908_v26 = vpack.c.bf16 %v231_v24, %v230_v23  ;;  %v911_v28 = vpack.c.bf16 %v233_v27, %v232_v25  ;;  %v744_v32 = vld [vmem:[%s1294_s3 + $0x60] ss:$0 sm:$0xff]  ;;  %v225_v33 = vshrl.u32 %v224_v30, 7  ;;  %v352_v5 = vld [vmem:[%s1296_s5 + $0x48] sm:$0xff]  ;;  %v345_v8 = vld [vmem:[%s1296_s5 + $0x10] sm:$0xff]  ;;  %s1302_s0 = smov (!%p42_p0, %s1291_s0), 63 }
   0xa   :  { %906 = vmatpush3.bf16.msra.mxu1 %v905_v16  ;;  %v343_v63 = vld [vmem:[%s1296_s5] sm:$0xff]  ;;  %v346_v9 = vld [vmem:[%s1296_s5 + $0x18] sm:$0xff]  ;;  %v353_v11 = vld [vmem:[%s1296_s5 + $0x50] sm:$0xff]  ;;  %s44_s27 = scalar_lea.vmem %s1298_s7, %s1302_s0 }
   0xb   :  { %907 = vmatprep.subr.bf16.mxu1 %v1018_v3  ;;  %v226_v37 = vsub.s32 0, %v225_v33  ;;  %v920_v2 = vpack.c.bf16 %v344_v0, %v343_v63  ;;  %v351_v4 = vld [vmem:[%s1296_s5 + $0x40] sm:$0xff]  ;;  %v923_v10 = vpack.c.bf16 %v346_v9, %v345_v8  ;;  %v354_v12 = vld [vmem:[%s1296_s5 + $0x58] sm:$0xff]  ;;  %v348_v15 = vld [vmem:[%s1296_s5 + $0x28] sm:$0xff] }
   0xc   :  { %897 = vmatpush3.bf16.msra.mxu0 %v896_v17  ;;  %v1127_v21 = vld [vmem:[#allocation3] sm:$0x1]  ;;  %v914_v7 = vpack.c.bf16 %v352_v5, %v351_v4  ;;  %v917_v13 = vpack.c.bf16 %v354_v12, %v353_v11  ;;  %v347_v14 = vld [vmem:[%s1296_s5 + $0x20] sm:$0xff]  ;;  %v349_v23 = vld [vmem:[%s1296_s5 + $0x30] sm:$0xff] }
   0xd   :  { %898 = vmatprep.subr.bf16.mxu0 %v1018_v3  ;;  %824 = vmatmul.mubr.msk.f32.vlgmr.msra.gmra.mrb[0].mxu1 %vm138_vm2, %v1127_v21  ;;  %v926_v16 = vpack.c.bf16 %v348_v15, %v347_v14  ;;  %v501_v17 = vld [vmem:[%s1296_s5 + $0x60] sm:$0xff]  ;;  %v502_v18 = vld [vmem:[%s1296_s5 + $0x68] sm:$0xff]  ;;  %v350_v24 = vld [vmem:[%s1296_s5 + $0x38] sm:$0xff] }
   0xe   :  { %834 = vmatprep.mubr.msk.f32.mxu1 %vm1019_vm0, %v1020_v6  ;;  %909 = vmatpush3.bf16.msra.mxu1 %v908_v26  ;;  %v932_v19 = vpack.c.bf16 %v502_v18, %v501_v17  ;;  %v929_v25 = vpack.c.bf16 %v350_v24, %v349_v23  ;;  %v503_v26 = vld [vmem:[%s1296_s5 + $0x70] sm:$0xff]  ;;  %v504_v27 = vld [vmem:[%s1296_s5 + $0x78] sm:$0xff]  ;;  %v610_v5 = vld [vmem:[%s1297_s6 + $0x20] sm:$0x1] }
   0xf   :  { %910 = vmatprep.subr.bf16.mxu1 %v1018_v3 }
  0x10   :  { %900 = vmatpush3.bf16.msra.mxu0 %v899_v20  ;;  %v342_v20 = vld [vmem:[%s44_s27] sm:$0x1] }
  0x11   :  { %913 = vmatprep.subr.bf16.mxu0 %v1018_v3 }
  0x12   :  { %912 = vmatpush3.bf16.msra.mxu1 %v911_v28  ;;  %v935_v28 = vpack.c.bf16 %v504_v27, %v503_v26 }
  0x13   :  { %813 = vmatmul.mubr.msk.f32.vlgmr.msra.gmra.mrb[0].mxu0 %vm64_vm3, %v1136_v22  ;;  %919 = vmatprep.subr.bf16.mxu1 %v1018_v3 }
  0x14   :  { %845 = vmatprep.mubr.msk.f32.mxu0 %vm1019_vm0, %v1020_v6  ;;  %915 = vmatpush3.bf16.msra.mxu0 %v914_v7 }
  0x15   :  { %916 = vmatprep.subr.bf16.mxu0 %v1018_v3 }
  0x18   :  { %918 = vmatpush3.bf16.msra.mxu0 %v917_v13 }
  0x19   :  { %931 = vmatprep.subr.bf16.mxu0 %v1018_v3 }
  0x1b   :  { %846 = vmatmul.mubr.msk.f32.vlgmr.msra.gmra.mrb[2].mxu0 %vm138_vm2, %v342_v20 }
  0x1c   :  { %933 = vmatpush3.bf16.msra.mxu0 %v932_v19  ;;  %875 = vmatprep.mubr.msk.f32.mxu0 %vm1019_vm0, %v1020_v6 }
  0x1d   :  { %934 = vmatprep.subr.bf16.mxu0 %v1018_v3 }
  0x20   :  { %936 = vmatpush3.bf16.msra.mxu0 %v935_v28 }
  0x21   :  { %937 = vmatprep.subr.bf16.mxu0 %v1018_v3 }
  0x23   :  { %876 = vmatmul.mubr.msk.f32.vlgmr.msra.gmra.mrb[4].mxu0 %vm138_vm2, %v1127_v21 }
  0x24   :  { %886 = vmatprep.mubr.msk.f32.mxu0 %vm1019_vm0, %v1020_v6 }
  0xe0   :  { %v219_v29 = vpop.f32.mrb[0].mxu1 }
  0xe1   :  { %v825_v31 = vpop.f32.mrb[1].mxu1  ;;  %v227_v38 = vrot.slane %v219_v29, %v226_v37  ;;  %v144_v29 = vld [vmem:[#allocation3 + $0x1] sm:$0x1] }
  0xe2   :  { %586 = vrot.lane.b32.xlu1 %v144_v29, %s1022_s13 }
  0xe6   :  { %v134_v34 = vpop.f32.mrb[0].mxu0 }
  0xe7   :  { %v135_v35 = vadd.f32 %v744_v32, %v134_v34  ;;  %v814_v36 = vpop.f32.mrb[1].mxu0 }
  0xe9   :  { %139 = vst.msk [vmem:[#allocation2] sm:$0xff] %vm138_vm2, %v135_v35 }
  0xf0   :  { %v223_v39 = vld [vmem:[#allocation2] sm:$0xff] }
  0xf1   :  { %v228_v40 = vadd.f32 %v227_v38, %v223_v39  ;;  %v424_v39 = vpop.f32.mrb[2].mxu0 }
  0xf3   :  { %952 = vtanh.f32 %v228_v40  ;;  %v847_v40 = vpop.f32.mrb[3].mxu0 }
  0xfd   :  { %v953_v41 = vpop.eup %952 }
  0xfe   :  { %835 = vmatmul.mubr.msk.f32.vlgmr.msra.gmra.mrb[2].mxu1 %vm138_vm2, %v953_v41  ;;  %v571_v41 = vpop.f32.mrb[4].mxu0 }
  0xff   :  { %864 = vmatprep.mubr.msk.f32.mxu1 %vm1019_vm0, %v1020_v6  ;;  %921 = vmatpush3.bf16.msra.mxu1 %v920_v2  ;;  %v877_v21 = vpop.f32.mrb[5].mxu0 }
 0x100   :  { %922 = vmatprep.subr.bf16.mxu1 %v1018_v3 }
 0x103   :  { %924 = vmatpush3.bf16.msra.mxu1 %v923_v10 }
 0x104   :  { %925 = vmatprep.subr.bf16.mxu1 %v1018_v3 }
 0x107   :  { %927 = vmatpush3.bf16.msra.mxu1 %v926_v16 }
 0x108   :  { %928 = vmatprep.subr.bf16.mxu1 %v1018_v3 }
 0x10b   :  { %930 = vmatpush3.bf16.msra.mxu1 %v929_v25 }
 0x1d1   :  { %v303_v43 = vpop.f32.mrb[2].mxu1 }
 0x1d2   :  { %v308_v44 = vsel %vm307_vm4, %v303_v43, -inf  ;;  %v836_v45 = vpop.f32.mrb[3].mxu1 }
 0x1d3   :  { %v309_v46 = vrot.slane %v308_v44, 4 }
 0x1d5   :  { %v310_v47 = vmax.f32 %v308_v44, %v309_v46 }
 0x1d7   :  { %v311_v48 = vrot.slane %v310_v47, 2 }
 0x1d9   :  { %v312_v49 = vmax.f32 %v310_v47, %v311_v48 }
 0x1db   :  { %v313_v50 = vrot.slane %v312_v49, 1 }
 0x1dd   :  { %v314_v51 = vmax.f32 %v312_v49, %v313_v50 }
 0x1df   :  { %v315_v52 = vsub.f32 %v303_v43, %v314_v51 }
 0x1e1   :  { %v316_v53 = vmul.f32 1.442695, %v315_v52 }
 0x1e3   :  { %954 = vpow2.f32 %v316_v53  ;;  %v587_v53 = vpop.permute.xlu1 %586 }
 0x1ed   :  { %v955_v54 = vpop.eup %954 }
 0x1ee   :  { %v318_v55 = vsel %vm307_vm4, %v955_v54, 0.0 }
 0x1ef   :  { %v319_v56 = vrot.slane %v318_v55, 4 }
 0x1f1   :  { %v320_v57 = vadd.f32 %v319_v56, %v318_v55 }
 0x1f3   :  { %v321_v58 = vrot.slane %v320_v57, 2 }
 0x1f5   :  { %v322_v59 = vadd.f32 %v321_v58, %v320_v57  ;;  %v606_v57 = vld [vmem:[%s1297_s6] sm:$0xff]  ;;  %v607_v58 = vld [vmem:[%s1297_s6 + $0x8] sm:$0xff] }
 0x1f7   :  { %v323_v60 = vrot.slane %v322_v59, 1 }
 0x1f9   :  { %v324_v61 = vadd.f32 %v323_v60, %v322_v59  ;;  %v608_v59 = vld [vmem:[%s1297_s6 + $0x10] sm:$0xff]  ;;  %v938_v60 = vpack.c.bf16 %v607_v58, %v606_v57 }
 0x1fb   :  { %956 = vrcp.f32 %v324_v61  ;;  %v609_v61 = vld [vmem:[%s1297_s6 + $0x18] sm:$0xff]  ;;  %939 = vmatpush3.bf16.msra.mxu0 %v938_v60  ;;  %s1024_s6 = smov [#allocation8]  }
 0x1fc   :  { %940 = vmatprep.subr.bf16.mxu0 %v1018_v3  ;;  %s729_s3 = sshll.u32 %s1024_s6, 4  ;;  %s730_s3 = int_to_ptr.vmem [resolvable:$true] %s729_s3 }
 0x1fd   :  { %s970_s4 = scalar_lea.vmem %s730_s3, 32  ;;  %p975_p2 = scmp.lt.s32.totalorder %s730_s3, %s730_s3 }
 0x1fe   :  { %p971_p1 = scmp.ne.s32.totalorder %s730_s3, %s970_s4  ;;  %p976_p3 = scmp.lt.s32.totalorder %s970_s4, %s970_s4 }
 0x200   :  { %p977_p4 = por %p976_p3, %p975_p2 }
 0x202   :  { %p978_p5 = pnand %p977_p4, %p971_p1 }
 0x205   :  { %v957_v62 = vpop.eup %956 }
 0x206   :  { %v326_v1 = vmul.f32 %v957_v62, %v955_v54  ;;  %v941_v62 = vpack.c.bf16 %v609_v61, %v608_v59 }
 0x208   :  { %330 = vperm.xlu0 %951, %v326_v1   ;;  %942 = vmatpush3.bf16.msra.mxu0 %v941_v62 }
 0x287   :  { %v331_v30 = vpop.permute.xlu0 %330 }
 0x288   :  { %v333_v31 = vmul.f32 %v331_v30, %v1136_v22  ;;  %v576_v22 = vld [vmem:[%s1296_s5 + $0x80] sm:$0x1] }
 0x28a   :  { %v335_v32 = vsel %vm64_vm3, %v333_v31, 0.0 }
 0x28b   :  { %v336_v33 = vrot.slane %v335_v32, 4 }
 0x28d   :  { %v337_v34 = vadd.f32 %v336_v33, %v335_v32 }
 0x28f   :  { %v338_v35 = vrot.slane %v337_v34, 2 }
 0x291   :  { %v339_v36 = vadd.f32 %v338_v35, %v337_v34 }
 0x293   :  { %v340_v37 = vrot.slane %v339_v36, 1 }
 0x295   :  { %v341_v38 = vadd.f32 %v340_v37, %v339_v36 }
 0x297   :  { %865 = vmatmul.mubr.msk.f32.vlgmr.msra.gmra.mrb[4].mxu1 %vm64_vm3, %v341_v38 }
 0x36a   :  { %v497_v42 = vpop.f32.mrb[4].mxu1 }
 0x36b   :  { %v498_v43 = vadd.f32 %v497_v42, %v424_v39  ;;  %v866_v6 = vpop.f32.mrb[5].mxu1 }
 0x36d   :  { %v575_v44 = vadd.f32 %v571_v41, %v498_v43 }
 0x36f   :  { %v577_v45 = vadd.f32 %v576_v22, %v575_v44 }
 0x371   :  { %958 = vtanh.f32 %v577_v45  ;;  %v751_v47 = vmul.f32 -1.442695, %v577_v45 }
 0x373   :  { %960 = vpow2.f32 %v751_v47 }
 0x37b   :  { %v959_v46 = vpop.eup %958 }
 0x37c   :  { %591 = vrot.lane.b32.xlu0 %v959_v46, %s1023_s15 }
 0x37d   :  { %v961_v48 = vpop.eup %960 }
 0x37e   :  { %v581_v49 = vadd.f32 1.0, %v961_v48 }
 0x380   :  { %962 = vrcp.f32 %v581_v49 }
 0x38a   :  { %v963_v50 = vpop.eup %962 }
 0x38b   :  { %v589_v54 = vmul.f32 %v963_v50, %v587_v53 }
 0x3ee   :  { %v592_v51 = vpop.permute.xlu0 %591 }
 0x3ef   :  { %v594_v52 = vmul.f32 %v963_v50, %v592_v51 }
 0x3f1   :  { %596 = vrot.lane.b32.xlu1 %v594_v52, %s1022_s13 }
 0x463   :  { %v597_v55 = vpop.permute.xlu1 %596 }
 0x464   :  { %v599_v56 = vadd.f32 %v597_v55, %v589_v54 }
 0x466   :  { %964 = vtanh.f32 %v599_v56  ;;  %v701_v2 = vrot.slane %v599_v56, 7 }
 0x470   :  { %v965_v63 = vpop.eup %964 }
 0x471   :  { %602 = vrot.lane.b32.xlu0 %v965_v63, %s1023_s15 }
 0x4e3   :  { %v603_v0 = vpop.permute.xlu0 %602 }
 0x4e4   :  { %v605_v1 = vmul.f32 %v963_v50, %v603_v0 }
 0x4e6   :  { %612 = vrot.lane.b32.xlu1 %v605_v1, %s1022_s13 }
 0x4ea   :  { %702 = vrot.lane.b32.xlu1 %v701_v2, %s1023_s15 }
 0x558   :  { %v613_v4 = vpop.permute.xlu1 %612 }
 0x559   :  { %887 = vmatmul.mubr.msk.f32.vlgmr.msra.gmra.mrb[6].mxu0 %vm138_vm2, %v613_v4 }
 0x55c   :  { %v703_v10 = vpop.permute.xlu1 %702 }
 0x55d   :  { %v705_v11 = vsel %vm686_vm5, %v605_v1, %v703_v10 }
 0x62c   :  { %v682_v7 = vpop.f32.mrb[6].mxu0 }
 0x62d   :  { %v683_v3 = vadd.f32 %v682_v7, %v610_v5  ;;  %v888_v8 = vpop.f32.mrb[7].mxu0 }
 0x62f   :  { %v687_v9 = vsel %vm686_vm5, %v683_v3, -inf }
 0x630   :  { %688 = vmax.xlane.f32.xlu0 %v687_v9 }
 0x646   :  { %707 = vrot.lane.b32.xlu0 %v705_v11, %s1022_s13 }
 0x6bd   :  { %v689_v12 = vpop.xlane.xlu0 %688 }
 0x6be   :  { %v690_v13 = vsub.f32 %v683_v3, %v689_v12 }
 0x6c0   :  { %v691_v14 = vmul.f32 1.442695, %v690_v13 }
 0x6c1   :  { %v708_v15 = vpop.permute.xlu0 %707 }
 0x6c2   :  { %966 = vpow2.f32 %v691_v14  ;;  %711 = vst.msk [vmem:[#allocation3] sm:$0x3] %vm141_vm1, %v708_v15  ;;  %712 = vst.msk [vmem:[#allocation8] sm:$0x3] %vm141_vm1, %v708_v15 }
 0x6cc   :  { %v967_v16 = vpop.eup %966 }
 0x6cd   :  { %v693_v17 = vsel %vm686_vm5, %v967_v16, 0.0 }
 0x6ce   :  { %694 = vadd.xlane.f32.xlu1 %v693_v17 }
 0x6cf   :  { %981 = shalt.err (!%p978_p5)
}
 0x6d0   :  { %s982_s26 = scalar_lea.hbm %s1300_s9, 32 }
 0x6d1   :  { %p983_p6 = scmp.ne.s32.totalorder %s1300_s9, %s982_s26  ;;  %p986_p7 = scmp.lt.u32.totalorder %s982_s26, %s1300_s9 }
 0x6d3   :  { %p988_p8 = pnand %p986_p7, %p983_p6 }
 0x6d5   :  { %991 = shalt.err (!%p988_p8)
}
 0x6d6   :  { %732 = dma.vmem_to_hbm [thread:$0]  %s730_s3, 32, %s1300_s9, [#allocation9]  }
 0x6d7   :  { %s1025_s12 = smov [#allocation6]  }
 0x6d8   :  { %s719_s0 = sshll.u32 %s1025_s12, 4  ;;  %s720_s0 = int_to_ptr.vmem [resolvable:$true] %s719_s0 }
 0x6d9   :  { %s992_s7 = scalar_lea.vmem %s720_s0, 16  ;;  %s996_s13 = scalar_lea.vmem %s720_s0, 32 }
 0x6da   :  { %p993_p9 = scmp.ne.s32.totalorder %s720_s0, %s992_s7  ;;  %p997_p10 = scmp.lt.s32.totalorder %s720_s0, %s720_s0 }
 0x6db   :  { %p998_p11 = scmp.lt.s32.totalorder %s996_s13, %s992_s7 }
 0x6dd   :  { %p999_p12 = por %p998_p11, %p997_p10 }
 0x6df   :  { %p1000_p13 = pnand %p999_p12, %p993_p9 }
 0x75b   :  { %v695_v18 = vpop.xlane.xlu1 %694 }
 0x75c   :  { %968 = vlog2.f32 %v695_v18 }
 0x766   :  { %v969_v19 = vpop.eup %968 }
 0x767   :  { %v697_v20 = vmul.f32 0.6931472, %v969_v19 }
 0x769   :  { %v698_v23 = vsub.f32 %v690_v13, %v697_v20 }
 0x76b   :  { %699 = vst [vmem:[#allocation6] sm:$0x1] %v698_v23 }
 0x76c   :  { %1003 = shalt.err (!%p1000_p13)
}
 0x76d   :  { %s1004_s9 = scalar_lea.hbm %s1299_s8, 16 }
 0x76e   :  { %p1005_p0 = scmp.ne.s32.totalorder %s1299_s8, %s1004_s9  ;;  %p1008_p1 = scmp.lt.u32.totalorder %s1004_s9, %s1299_s8 }
 0x770   :  { %p1010_p2 = pnand %p1008_p1, %p1005_p0 }
 0x772   :  { %1013 = shalt.err (!%p1010_p2)
}
 0x773   :  { %722 = dma.vmem_to_hbm [thread:$0]  %s720_s0, 16, %s1299_s8, [#allocation7]  }
 0x774   :  { %1014 = dma.done.wait [#allocation7], 16  }
 0x775   :  { %1015 = vsyncadd [#allocation7], 4294967280 }
 0x776   :  { %1016 = dma.done.wait [#allocation9], 32  }
 0x777   :  { %1017 = vsyncadd [#allocation9], 4294967264 }
 0x778   :  { %739 = vsyncpa [#allocation7], 1 }
 0x779   :  { %740 = vsyncpa [#allocation9], 1 }

</bundles_post_ra>
